<compile_context>
chip_gen: v5e
topology: v5e:2x2
jax: 0.10.0
libtpu: 0.0.40
codegen_flags: <defaults>
</compile_context>

<pallas_src>
import math

import jax
import jax.numpy as jnp
from jax import lax
from jax.experimental import pallas as pl
from jax.experimental.pallas import tpu as pltpu


def _style_vec_kernel(x_ref, w_ref, b_ref, o_ref):
    """Fused MLP: x_ref (bn, emb), w_ref (depth, emb, emb), b_ref (depth, 1, emb)."""
    depth = w_ref.shape[0]

    # normalize_2nd_moment over the feature dim (dim=1), eps=1e-6 as in the module.
    x = x_ref[...].astype(jnp.float32)
    mean_sq = jnp.mean(x * x, axis=1, keepdims=True)
    h = x * lax.rsqrt(mean_sq + 1e-6)

    # `depth` is small and static -> unrolled; activation carried in a local value
    # (no scratch, no per-layer VMEM copies).
    for i in range(depth):
        w = w_ref[i]                       # (emb, emb); scale * sqrt(2) pre-folded, bf16
        b = b_ref[i]                       # (1, emb);  lr_mul * sqrt(2) pre-folded, f32
        y = jnp.dot(h.astype(w.dtype), w, preferred_element_type=jnp.float32) + b
        # leaky_relu(y, 0.2) * sqrt(2) == leaky_relu(sqrt(2) * y, 0.2); the gain is
        # already folded into w and b, so only the lrelu itself remains here.
        h = jnp.maximum(y, 0.2 * y)

    o_ref[...] = h.astype(o_ref.dtype)


def prepare_style_params(weights, biases, lr_mul=0.1, weight_dtype=jnp.bfloat16):
    """One-time parameter prep (keep OUT of the per-call hot path).

    weights: (depth, emb_out, emb_in) raw EqualLinear params; biases: (depth, emb_out).
    Folds the EqualLinear scale (lr_mul/sqrt(emb_in)), the bias lr_mul, and the
    lrelu gain sqrt(2) into the stacked params, and pre-transposes weights so the
    kernel computes h @ W.
    """
    depth, emb_out, emb_in = weights.shape
    scale = lr_mul / math.sqrt(emb_in)
    gain = math.sqrt(2.0)
    w = jnp.transpose(weights, (0, 2, 1)).astype(jnp.float32)
    w = (w * jnp.float32(scale * gain)).astype(weight_dtype)
    b = (biases.astype(jnp.float32) * jnp.float32(lr_mul * gain)).reshape(depth, 1, emb_out)
    return w, b


@jax.jit
def style_vectorizer(x, w_stacked, b_stacked):
    """x: (N, emb); w_stacked: (depth, emb, emb) prepared; b_stacked: (depth, 1, emb)."""
    n, emb = x.shape
    depth = w_stacked.shape[0]
    assert w_stacked.shape[1] == emb and w_stacked.shape[2] == emb

    # Batch tiling: large N is split into independent tiles (parallel grid axis ->
    # sharded across v7x's 2 TensorCores); small N uses a single whole-array block.
    # NOTE: for production sizes (emb>=512, depth>=8) the resident weight stack
    # should be budgeted against v7x's 64 MiB VMEM (vmem_limit_bytes) -- trivial here.
    block_n = 512
    if n <= block_n or n % block_n != 0:
        block_n = n
    grid = (n // block_n,)

    return pl.pallas_call(
        _style_vec_kernel,
        out_shape=jax.ShapeDtypeStruct((n, emb), x.dtype),
        grid_spec=pltpu.PrefetchScalarGridSpec(
            num_scalar_prefetch=0,
            grid=grid,
            in_specs=[
                pl.BlockSpec((block_n, emb), lambda i: (i, 0)),        # batch tile
                pl.BlockSpec((depth, emb, emb), lambda i: (0, 0, 0)),  # whole weight stack (VMEM-resident)
                pl.BlockSpec((depth, 1, emb), lambda i: (0, 0, 0)),    # whole bias stack
            ],
            out_specs=pl.BlockSpec((block_n, emb), lambda i: (i, 0)),
        ),
        compiler_params=pltpu.CompilerParams(
            dimension_semantics=("parallel",),   # batch tiles are independent
        ),
    )(x, w_stacked, b_stacked)


def _reference(x, weights, biases, lr_mul=0.1):
    """Pure-JAX f32 reference mirroring the PyTorch module."""
    x = x.astype(jnp.float32)
    x = x * lax.rsqrt(jnp.mean(jnp.square(x), axis=1, keepdims=True) + 1e-6)
    depth, _, emb_in = weights.shape
    scale = lr_mul / math.sqrt(emb_in)
    for i in range(depth):
        w = weights[i].astype(jnp.float32) * scale     # (out, in)
        b = biases[i].astype(jnp.float32) * lr_mul
        y = x @ w.T + b[None, :]
        x = jnp.where(y >= 0.0, y, 0.2 * y) * math.sqrt(2.0)
    return x


if __name__ == "__main__":
    # Small shapes consistent with the module: emb=32, depth=4, batch=8.
    N, EMB, DEPTH = 8, 32, 4
    LR_MUL = 0.1

    key = jax.random.PRNGKey(0)
    k_x, k_w, k_b = jax.random.split(key, 3)

    x = jax.random.normal(k_x, (N, EMB), dtype=jnp.float32)
    # EqualLinear init: weight = randn(out, in) / lr_mul; use non-zero biases to
    # exercise the bias path (module init is zeros; trained biases are not).
    weights = jax.random.normal(k_w, (DEPTH, EMB, EMB), dtype=jnp.float32) / LR_MUL
    biases = 0.5 * jax.random.normal(k_b, (DEPTH, EMB), dtype=jnp.float32)

    # One-time prep (folds scales / gain, transposes, casts weights to bf16).
    w_stacked, b_stacked = prepare_style_params(weights, biases, lr_mul=LR_MUL)

    out = style_vectorizer(x, w_stacked, b_stacked)
    out = jax.block_until_ready(out)

    ref = _reference(x, weights, biases, lr_mul=LR_MUL)
    assert out.shape == (N, EMB)
    # bf16 weights / bf16 matmul operands vs. the f32 reference -> loosened tolerance.
    assert jnp.allclose(out, ref, atol=5e-2, rtol=5e-2), "mismatch vs reference"

    print("KERNEL_OK")
</pallas_src>

<mosaic_0001>
module attributes {stable_mosaic.version = 11 : i64} {
  func.func @_style_vec_kernel(%arg0: i32, %arg1: memref<8x32xf32, #tpu.memory_space<vmem>>, %arg2: memref<4x32x32xbf16, #tpu.memory_space<vmem>>, %arg3: memref<4x1x32xf32, #tpu.memory_space<vmem>>, %arg4: memref<8x32xf32, #tpu.memory_space<vmem>>) attributes {dimension_semantics = [#tpu.dimension_semantics<parallel>], iteration_bounds = array<i64: 1>, scalar_prefetch = 0 : i64, scratch_operands = 0 : i64, tpu.core_type = #tpu.core_type<tc>, window_params = [{transform_indices = @transform_0, window_bounds = array<i64: 8, 32>}, {pipeline_mode = #tpu.pipeline_mode<synchronous>, transform_indices = @transform_1, window_bounds = array<i64: 4, 32, 32>}, {pipeline_mode = #tpu.pipeline_mode<synchronous>, transform_indices = @transform_2, window_bounds = array<i64: 4, 1, 32>}, {transform_indices = @transform_3, window_bounds = array<i64: 8, 32>}]} {
    %c0 = arith.constant 0 : index
    %c0_0 = arith.constant 0 : index
    %0 = vector.load %arg1[%c0, %c0_0] : memref<8x32xf32, #tpu.memory_space<vmem>>, vector<8x32xf32>
    %1 = arith.mulf %0, %0 : vector<8x32xf32>
    %cst = arith.constant dense<0.000000e+00> : vector<8xf32>
    %2 = vector.multi_reduction <add>, %1, %cst [1] : vector<8x32xf32> to vector<8xf32>
    %3 = vector.shape_cast %2 : vector<8xf32> to vector<8x1xf32>
    %cst_1 = arith.constant 3.200000e+01 : f32
    %4 = vector.broadcast %cst_1 : f32 to vector<8x1xf32>
    %5 = arith.divf %3, %4 : vector<8x1xf32>
    %cst_2 = arith.constant 9.99999997E-7 : f32
    %6 = vector.broadcast %cst_2 : f32 to vector<8x1xf32>
    %7 = arith.addf %5, %6 : vector<8x1xf32>
    %8 = math.rsqrt %7 : vector<8x1xf32>
    %9 = vector.broadcast %8 : vector<8x1xf32> to vector<8x32xf32>
    %10 = arith.mulf %0, %9 : vector<8x32xf32>
    %c0_3 = arith.constant 0 : index
    %c0_4 = arith.constant 0 : index
    %c0_5 = arith.constant 0 : index
    %11 = vector.load %arg2[%c0_3, %c0_4, %c0_5] : memref<4x32x32xbf16, #tpu.memory_space<vmem>>, vector<1x32x32xbf16>
    %12 = vector.shape_cast %11 : vector<1x32x32xbf16> to vector<32x32xbf16>
    %c0_6 = arith.constant 0 : index
    %c0_7 = arith.constant 0 : index
    %c0_8 = arith.constant 0 : index
    %13 = vector.load %arg3[%c0_6, %c0_7, %c0_8] : memref<4x1x32xf32, #tpu.memory_space<vmem>>, vector<1x1x32xf32>
    %14 = vector.shape_cast %13 : vector<1x1x32xf32> to vector<1x32xf32>
    %15 = arith.truncf %10 : vector<8x32xf32> to vector<8x32xbf16>
    %cst_9 = arith.constant dense<0.000000e+00> : vector<8x32xf32>
    %16 = tpu.matmul %15, %12, %cst_9 {dimension_numbers = #tpu.dot_dimension_numbers<[1], [0], [0], [1], [0, 0, 1, 1], [], []>} : vector<8x32xbf16>, vector<32x32xbf16>, vector<8x32xf32> -> vector<8x32xf32>
    %17 = vector.broadcast %14 : vector<1x32xf32> to vector<8x32xf32>
    %18 = arith.addf %16, %17 : vector<8x32xf32>
    %cst_10 = arith.constant 2.000000e-01 : f32
    %19 = vector.broadcast %cst_10 : f32 to vector<8x32xf32>
    %20 = arith.mulf %19, %18 : vector<8x32xf32>
    %21 = arith.maximumf %18, %20 : vector<8x32xf32>
    %c1 = arith.constant 1 : index
    %c0_11 = arith.constant 0 : index
    %c0_12 = arith.constant 0 : index
    %22 = vector.load %arg2[%c1, %c0_11, %c0_12] : memref<4x32x32xbf16, #tpu.memory_space<vmem>>, vector<1x32x32xbf16>
    %23 = vector.shape_cast %22 : vector<1x32x32xbf16> to vector<32x32xbf16>
    %c1_13 = arith.constant 1 : index
    %c0_14 = arith.constant 0 : index
    %c0_15 = arith.constant 0 : index
    %24 = vector.load %arg3[%c1_13, %c0_14, %c0_15] : memref<4x1x32xf32, #tpu.memory_space<vmem>>, vector<1x1x32xf32>
    %25 = vector.shape_cast %24 : vector<1x1x32xf32> to vector<1x32xf32>
    %26 = arith.truncf %21 : vector<8x32xf32> to vector<8x32xbf16>
    %cst_16 = arith.constant dense<0.000000e+00> : vector<8x32xf32>
    %27 = tpu.matmul %26, %23, %cst_16 {dimension_numbers = #tpu.dot_dimension_numbers<[1], [0], [0], [1], [0, 0, 1, 1], [], []>} : vector<8x32xbf16>, vector<32x32xbf16>, vector<8x32xf32> -> vector<8x32xf32>
    %28 = vector.broadcast %25 : vector<1x32xf32> to vector<8x32xf32>
    %29 = arith.addf %27, %28 : vector<8x32xf32>
    %cst_17 = arith.constant 2.000000e-01 : f32
    %30 = vector.broadcast %cst_17 : f32 to vector<8x32xf32>
    %31 = arith.mulf %30, %29 : vector<8x32xf32>
    %32 = arith.maximumf %29, %31 : vector<8x32xf32>
    %c2 = arith.constant 2 : index
    %c0_18 = arith.constant 0 : index
    %c0_19 = arith.constant 0 : index
    %33 = vector.load %arg2[%c2, %c0_18, %c0_19] : memref<4x32x32xbf16, #tpu.memory_space<vmem>>, vector<1x32x32xbf16>
    %34 = vector.shape_cast %33 : vector<1x32x32xbf16> to vector<32x32xbf16>
    %c2_20 = arith.constant 2 : index
    %c0_21 = arith.constant 0 : index
    %c0_22 = arith.constant 0 : index
    %35 = vector.load %arg3[%c2_20, %c0_21, %c0_22] : memref<4x1x32xf32, #tpu.memory_space<vmem>>, vector<1x1x32xf32>
    %36 = vector.shape_cast %35 : vector<1x1x32xf32> to vector<1x32xf32>
    %37 = arith.truncf %32 : vector<8x32xf32> to vector<8x32xbf16>
    %cst_23 = arith.constant dense<0.000000e+00> : vector<8x32xf32>
    %38 = tpu.matmul %37, %34, %cst_23 {dimension_numbers = #tpu.dot_dimension_numbers<[1], [0], [0], [1], [0, 0, 1, 1], [], []>} : vector<8x32xbf16>, vector<32x32xbf16>, vector<8x32xf32> -> vector<8x32xf32>
    %39 = vector.broadcast %36 : vector<1x32xf32> to vector<8x32xf32>
    %40 = arith.addf %38, %39 : vector<8x32xf32>
    %cst_24 = arith.constant 2.000000e-01 : f32
    %41 = vector.broadcast %cst_24 : f32 to vector<8x32xf32>
    %42 = arith.mulf %41, %40 : vector<8x32xf32>
    %43 = arith.maximumf %40, %42 : vector<8x32xf32>
    %c3 = arith.constant 3 : index
    %c0_25 = arith.constant 0 : index
    %c0_26 = arith.constant 0 : index
    %44 = vector.load %arg2[%c3, %c0_25, %c0_26] : memref<4x32x32xbf16, #tpu.memory_space<vmem>>, vector<1x32x32xbf16>
    %45 = vector.shape_cast %44 : vector<1x32x32xbf16> to vector<32x32xbf16>
    %c3_27 = arith.constant 3 : index
    %c0_28 = arith.constant 0 : index
    %c0_29 = arith.constant 0 : index
    %46 = vector.load %arg3[%c3_27, %c0_28, %c0_29] : memref<4x1x32xf32, #tpu.memory_space<vmem>>, vector<1x1x32xf32>
    %47 = vector.shape_cast %46 : vector<1x1x32xf32> to vector<1x32xf32>
    %48 = arith.truncf %43 : vector<8x32xf32> to vector<8x32xbf16>
    %cst_30 = arith.constant dense<0.000000e+00> : vector<8x32xf32>
    %49 = tpu.matmul %48, %45, %cst_30 {dimension_numbers = #tpu.dot_dimension_numbers<[1], [0], [0], [1], [0, 0, 1, 1], [], []>} : vector<8x32xbf16>, vector<32x32xbf16>, vector<8x32xf32> -> vector<8x32xf32>
    %50 = vector.broadcast %47 : vector<1x32xf32> to vector<8x32xf32>
    %51 = arith.addf %49, %50 : vector<8x32xf32>
    %cst_31 = arith.constant 2.000000e-01 : f32
    %52 = vector.broadcast %cst_31 : f32 to vector<8x32xf32>
    %53 = arith.mulf %52, %51 : vector<8x32xf32>
    %54 = arith.maximumf %51, %53 : vector<8x32xf32>
    %c0_32 = arith.constant 0 : index
    %c0_33 = arith.constant 0 : index
    %55 = vector.load %arg4[%c0_32, %c0_33] : memref<8x32xf32, #tpu.memory_space<vmem>>, vector<8x32xf32>
    tpu.vector_store %arg4[%c0_32, %c0_33], %54 {strides = array<i32>} : memref<8x32xf32, #tpu.memory_space<vmem>>, vector<8x32xf32>,
    return
  }
  func.func @transform_0(%arg0: i32) -> (i32, i32) {
    %c0_i32 = arith.constant 0 : i32
    %c0_i32_0 = arith.constant 0 : i32
    return %arg0, %c0_i32 : i32, i32
  }
  func.func @transform_1(%arg0: i32) -> (i32, i32, i32) {
    %c0_i32 = arith.constant 0 : i32
    %c0_i32_0 = arith.constant 0 : i32
    %c0_i32_1 = arith.constant 0 : i32
    %c0_i32_2 = arith.constant 0 : i32
    return %c0_i32, %c0_i32_0, %c0_i32_1 : i32, i32, i32
  }
  func.func @transform_2(%arg0: i32) -> (i32, i32, i32) {
    %c0_i32 = arith.constant 0 : i32
    %c0_i32_0 = arith.constant 0 : i32
    %c0_i32_1 = arith.constant 0 : i32
    %c0_i32_2 = arith.constant 0 : i32
    return %c0_i32, %c0_i32_0, %c0_i32_1 : i32, i32, i32
  }
  func.func @transform_3(%arg0: i32) -> (i32, i32) {
    %c0_i32 = arith.constant 0 : i32
    %c0_i32_0 = arith.constant 0 : i32
    return %arg0, %c0_i32 : i32, i32
  }
}

</mosaic_0001>

<bundles_post_ra>
// kernel: style_vectorizer.1
= control target key start
LH: loop header
LB: loop body
LE: loop exit
PB: predicated region body
PF: predicated region fallthrough
CT: control target
= control target key end

     0   :  { %8 = vsyncpa [#allocation3], 0  ;;  %s478_s0 = inlined_call_operand.hbm [shape: f32[8,32], index: 0, kind: input, shape index: {}]   ;;  %s479_s1 = inlined_call_operand.hbm [shape: bf16[4,32,32], index: 1, kind: input, shape index: {}]   ;;  %s480_s2 = inlined_call_operand.hbm [shape: f32[4,1,32], index: 2, kind: input, shape index: {}]   ;;  %s481_s3 = inlined_call_operand.hbm [shape: f32[8,32], index: 3, kind: output, shape index: {}]  }
   0x1   :  { %9 = vsyncpa [#allocation6], 0  ;;  %s26_s14 = sshll.u32 %s479_s1, 4  ;;  %s27_s14 = int_to_ptr.hbm [resolvable:$true] %s26_s14 }
   0x2   :  { %10 = vsyncpa [#allocation4], 0  ;;  %s431_s15 = smov [#allocation5]   ;;  %s16_s19 = sshll.u32 %s478_s0, 4  ;;  %s17_s19 = int_to_ptr.hbm [resolvable:$true] %s16_s19 }
   0x3   :  { %s28_s16 = sshll.u32 %s431_s15, 4  ;;  %s432_s20 = smov 64   ;;  %s29_s16 = int_to_ptr.vmem [resolvable:$true] %s28_s16 }
   0x4   :  { %s433_s21 = smov 4   ;;  %s434_s22 = smov [#allocation2]  }
   0x5   :  { %34 = dma.hbm_to_vmem [thread:$0]  %s27_s14, 1024, %s29_s16, [#allocation6], %s432_s20, %s432_s20, %s433_s21  }
   0x6   :  { %s18_s23 = sshll.u32 %s434_s22, 4  ;;  %s39_s26 = sshll.u32 %s480_s2, 4  ;;  %s19_s23 = int_to_ptr.vmem [resolvable:$true] %s18_s23  ;;  %s40_s26 = int_to_ptr.hbm [resolvable:$true] %s39_s26 }
   0x7   :  { %21 = dma.hbm_to_vmem [thread:$0]  %s17_s19, 128, %s19_s23, [#allocation3]  }
   0x8   :  { %s435_s1 = smov [#allocation7]   ;;  %s436_s28 = smov 16  }
   0x9   :  { %s41_s27 = sshll.u32 %s435_s1, 4  ;;  %s437_s29 = smov 1   ;;  %s42_s27 = int_to_ptr.vmem [resolvable:$true] %s41_s27 }
   0xa   :  { %47 = dma.hbm_to_vmem [thread:$0]  %s40_s26, 64, %s42_s27, [#allocation6], %s436_s28, %s436_s28, %s437_s29  }
   0xb   :  { %425 = dma.done.wait [#allocation3], 128  }
   0xc   :  { %426 = vsyncadd [#allocation3], 4294967168 }
   0xd   :  { %427 = dma.done.wait [#allocation6], 1088  }
   0xe   :  { %428 = vsyncadd [#allocation6], 4294966208  ;;  %v61_v0 = vld [vmem:[#allocation2] sm:$0xff]  ;;  %vm63_vm0 = vcmask 261120   ;;  %v438_v3 = vmov 32.0   ;;  %v305_v7 = vld [vmem:[#allocation5 + $0x8] sm:$0xff] }
   0xf   :  { %v62_v1 = vmul.f32 %v61_v0, %v61_v0  ;;  %325 = vrcp.f32 %v438_v3  ;;  %117 = vmatpush.bf16.msra.mxu0 %v305_v7  ;;  %v304_v8 = vld [vmem:[#allocation5] sm:$0xff]  ;;  %v307_v24 = vld [vmem:[#allocation5 + $0x18] sm:$0xff]  ;;  %v306_v25 = vld [vmem:[#allocation5 + $0x10] sm:$0xff]  ;;  %s439_s0 = smov [#allocation8]   ;;  %s257_s5 = sshll.u32 %s481_s3, 4  ;;  %s258_s5 = int_to_ptr.hbm [resolvable:$true] %s257_s5 }
  0x10   :  { %158 = vmatpush.bf16.msra.mxu1 %v307_v24  ;;  %v321_v26 = vld [vmem:[#allocation7] ss:$0 sm:$0xff]  ;;  %v309_v33 = vld [vmem:[#allocation5 + $0x28] sm:$0xff]  ;;  %v322_v35 = vld [vmem:[#allocation7 + $0x1] ss:$0 sm:$0xff]  ;;  %s255_s2 = sshll.u32 %s439_s0, 4  ;;  %s256_s2 = int_to_ptr.vmem [resolvable:$true] %s255_s2 }
  0x11   :  { %v64_v2 = vsel %vm63_vm0, %v62_v1, 0.0  ;;  %199 = vmatpush.bf16.msra.mxu2 %v309_v33  ;;  %v308_v34 = vld [vmem:[#allocation5 + $0x20] sm:$0xff]  ;;  %v311_v42 = vld [vmem:[#allocation5 + $0x38] sm:$0xff]  ;;  %v310_v43 = vld [vmem:[#allocation5 + $0x30] sm:$0xff] }
  0x12   :  { %65 = vadd.xlane.f32.xlu0 %v64_v2  ;;  %240 = vmatpush.bf16.msra.mxu3 %v311_v42  ;;  %v323_v44 = vld [vmem:[#allocation7 + $0x2] ss:$0 sm:$0xff]  ;;  %v324_v51 = vld [vmem:[#allocation7 + $0x3] ss:$0 sm:$0xff] }
  0x13   :  { %118 = vmatpush.bf16.msra.mxu0 %v304_v8 }
  0x14   :  { %159 = vmatpush.bf16.msra.mxu1 %v306_v25 }
  0x15   :  { %v326_v4 = vpop.eup %325  ;;  %200 = vmatpush.bf16.msra.mxu2 %v308_v34 }
  0x16   :  { %v68_v5 = vmul.f32 32.0, %v326_v4  ;;  %vm72_vm1 = vweird.f32 %v326_v4  ;;  %241 = vmatpush.bf16.msra.mxu3 %v310_v43 }
  0x18   :  { %v69_v6 = vsub.f32 1.0, %v68_v5 }
  0x1a   :  { %v70_v9 = vmul.f32 %v326_v4, %v69_v6 }
  0x1c   :  { %v71_v10 = vadd.f32 %v326_v4, %v70_v9 }
  0x1e   :  { %v73_v11 = vsel %vm72_vm1, %v326_v4, %v71_v10 }
  0x85   :  { %v66_v12 = vpop.xlane.xlu0 %65 }
  0x86   :  { %v74_v13 = vmul.f32 %v73_v11, %v66_v12 }
  0x88   :  { %v75_v14 = vadd.f32 1e-06, %v74_v13 }
  0x8a   :  { %327 = vrsqrt.f32 %v75_v14  ;;  %vm82_vm3 = vweird.f32 %v75_v14 }
  0x90   :  { %v328_v15 = vpop.eup %327 }
  0x91   :  { %v77_v16 = vmul.f32 %v328_v15, %v75_v14  ;;  %vm83_vm2 = vweird.f32 %v328_v15 }
  0x92   :  { %vm84_vm4 = vmor %vm82_vm3, %vm83_vm2 }
  0x93   :  { %v78_v17 = vmul.f32 %v328_v15, %v77_v16 }
  0x95   :  { %v79_v18 = vmul.f32 0.5, %v78_v17 }
  0x97   :  { %v80_v19 = vsub.f32 1.5, %v79_v18 }
  0x99   :  { %v81_v20 = vmul.f32 %v328_v15, %v80_v19 }
  0x9b   :  { %v85_v21 = vsel %vm84_vm4, %v328_v15, %v81_v20 }
  0x9c   :  { %v86_v22 = vmul.f32 %v85_v21, %v61_v0 }
  0x9e   :  { %v92_v23 = vpack.c.bf16 %v86_v22, %v86_v22 }
  0xa0   :  { %276 = vmatmul.msk.bf16.vlgmr.msra.gmra.mxu0 %vm63_vm0, %v92_v23 }
 0x11d   :  { %v120_v27 = vpop.f32.mrf.mxu0 }
 0x11e   :  { %v121_v28 = vadd.f32 %v321_v26, %v120_v27 }
 0x120   :  { %v124_v29 = vmul.f32 0.2, %v121_v28 }
 0x122   :  { %v125_v30 = vmax.f32 %v121_v28, %v124_v29 }
 0x124   :  { %v133_v31 = vpack.c.bf16 %v125_v30, %v125_v30 }
 0x125   :  { %v122_v32 = vpop.f32.mrf.mxu0 }
 0x126   :  { %285 = vmatmul.msk.bf16.vlgmr.msra.gmra.mxu1 %vm63_vm0, %v133_v31 }
 0x1a3   :  { %v161_v36 = vpop.f32.mrf.mxu1 }
 0x1a4   :  { %v162_v37 = vadd.f32 %v322_v35, %v161_v36 }
 0x1a6   :  { %v165_v38 = vmul.f32 0.2, %v162_v37 }
 0x1a8   :  { %v166_v39 = vmax.f32 %v162_v37, %v165_v38 }
 0x1aa   :  { %v174_v40 = vpack.c.bf16 %v166_v39, %v166_v39 }
 0x1ab   :  { %v163_v41 = vpop.f32.mrf.mxu1 }
 0x1ac   :  { %294 = vmatmul.msk.bf16.vlgmr.msra.gmra.mxu2 %vm63_vm0, %v174_v40 }
 0x22f   :  { %v202_v45 = vpop.f32.mrf.mxu2 }
 0x230   :  { %v203_v46 = vadd.f32 %v323_v44, %v202_v45 }
 0x232   :  { %v206_v47 = vmul.f32 0.2, %v203_v46 }
 0x234   :  { %v207_v48 = vmax.f32 %v203_v46, %v206_v47 }
 0x236   :  { %v215_v49 = vpack.c.bf16 %v207_v48, %v207_v48 }
 0x237   :  { %v204_v50 = vpop.f32.mrf.mxu2 }
 0x238   :  { %303 = vmatmul.msk.bf16.vlgmr.msra.gmra.mxu3 %vm63_vm0, %v215_v49 }
 0x2bb   :  { %v243_v52 = vpop.f32.mrf.mxu3 }
 0x2bc   :  { %v244_v53 = vadd.f32 %v324_v51, %v243_v52 }
 0x2be   :  { %v247_v54 = vmul.f32 0.2, %v244_v53 }
 0x2c0   :  { %v248_v55 = vmax.f32 %v244_v53, %v247_v54 }
 0x2c2   :  { %249 = vst.msk [vmem:[#allocation8] sm:$0xff] %vm63_vm0, %v248_v55 }
 0x2c3   :  { %v245_v56 = vpop.f32.mrf.mxu3  ;;  %260 = dma.vmem_to_hbm [thread:$0]  %s256_s2, 128, %s258_s5, [#allocation4]  }
 0x2c4   :  { %429 = dma.done.wait [#allocation4], 128  }
 0x2c5   :  { %430 = vsyncadd [#allocation4], 4294967168 }
 0x2c6   :  { %265 = vsyncpa [#allocation3], 1 }
 0x2c7   :  { %266 = vsyncpa [#allocation6], 1 }
 0x2c8   :  { %267 = vsyncpa [#allocation4], 1 }

</bundles_post_ra>
